<compile_context>
chip_gen: v5e
topology: v5e:2x2
jax: 0.10.0
libtpu: 0.0.40
codegen_flags: <defaults>
</compile_context>

<pallas_src>
import jax
import jax.numpy as jnp
from jax import lax
from jax.experimental import pallas as pl
from jax.experimental.pallas import tpu as pltpu


def _round_up(n, m):
    return (n + m - 1) // m * m


def alphazero_kernel(xt_ref, w1t_ref, b1t_ref, wht_ref, bht_ref, out_ref):
    """Feature-major fused forward.

    xt_ref : (K, tm)    f32   input block, batch on lanes
    w1t_ref: (H, K)     f32   first-layer weights, column k = W1 row k
    b1t_ref: (H, 1)     f32
    wht_ref: (1+A, H)   bf16  fused [policy | value] head weights (value last)
    bht_ref: (1+A, 1)   f32
    out_ref: (1+A, tm)  f32   rows 0..A-1 = softmax(pi), row A = tanh(v)
    """
    K = xt_ref.shape[0]
    A = out_ref.shape[0] - 1

    # First layer on the VPU: K=4 is far too small a contraction for the MXU,
    # so compute h^T = sum_k W1[:, k] * x^T[k, :] as K rank-1 broadcast FMAs.
    h = w1t_ref[:, 0:1] * xt_ref[0:1, :]
    for k in range(1, K):                          # K is tiny & static -> unrolls
        h = h + w1t_ref[:, k:k + 1] * xt_ref[k:k + 1, :]
    h = jnp.maximum(h + b1t_ref[...], 0.0)         # (H, tm), f32

    # Fused heads on the MXU: (1+A, H) @ (H, tm), bf16 operands, f32 accum.
    heads = jnp.dot(wht_ref[...], h.astype(jnp.bfloat16),
                    preferred_element_type=jnp.float32)
    heads = heads + bht_ref[...]                   # (1+A, tm)

    # Row A is the value head; rows 0..A-1 are the policy logits.
    row = lax.broadcasted_iota(jnp.int32, heads.shape, dimension=0)
    is_value = row == A

    # Softmax over the policy rows only: mask the value row to -inf so it
    # contributes exp(-inf) = 0 to the max and the sum.  axis=0 is a short
    # (<= 8 sublanes) reduce — no cross-lane XLU tree needed.
    logits = jnp.where(is_value, -jnp.inf, heads)
    m = jnp.max(logits, axis=0, keepdims=True)     # (1, tm)
    e = jnp.exp(logits - m)                        # exp(-inf) = 0 on value row
    denom = jnp.sum(e, axis=0, keepdims=True)      # (1, tm)
    # approx=False is the exact reciprocal path; approx=True (single EUP vrcp)
    # would add ~1e-3 relative error to the probabilities.
    pi = e * pl.reciprocal(denom, approx=False)

    out_ref[...] = jnp.where(is_value, jnp.tanh(heads), pi)


def alphazero_forward(xs, prepared, *, block_cols=2048):
    """xs: (B, input_length) f32; prepared: output of prepare_params().

    Returns (vs (B, 1), pis (B, A)).
    """
    B, K = xs.shape
    H = prepared["w1t"].shape[0]
    NH = prepared["whT"].shape[0]
    A = NH - 1

    # Batch on the lane axis: tile width is a multiple of 128 lanes, capped so
    # that B > 128 produces at least 2 grid steps (megacore sharding on v7x).
    tm = min(_round_up(block_cols, 128), _round_up(pl.cdiv(B, 2), 128))
    Bp = _round_up(B, tm)

    xt = xs.T                                      # (K, B), feature-major
    if Bp != B:                                    # no copy when tm divides B
        xt = jnp.pad(xt, ((0, 0), (0, Bp - B)))    # zero cols -> finite outputs

    out = pl.pallas_call(
        alphazero_kernel,
        out_shape=jax.ShapeDtypeStruct((NH, Bp), jnp.float32),
        grid=(Bp // tm,),
        in_specs=[
            pl.BlockSpec((K, tm), lambda i: (0, i)),   # x^T: tiled over batch
            pl.BlockSpec((H, K), lambda i: (0, 0)),    # W1^T: resident
            pl.BlockSpec((H, 1), lambda i: (0, 0)),    # b1^T: resident
            pl.BlockSpec((NH, H), lambda i: (0, 0)),   # fused head weights (bf16)
            pl.BlockSpec((NH, 1), lambda i: (0, 0)),   # fused head biases
        ],
        out_specs=pl.BlockSpec((NH, tm), lambda i: (0, i)),
        compiler_params=pltpu.CompilerParams(
            dimension_semantics=("parallel",),
            vmem_limit_bytes=32 * 1024 * 1024,
        ),
    )(xt, prepared["w1t"], prepared["b1t"], prepared["whT"], prepared["bhT"])

    outT = out[:, :B].T                            # (B, 1+A)
    return outT[:, A:A + 1], outT[:, :A]           # vs (B,1), pis (B,A)


def init_params(key, input_length, action_length, hidden=256):
    """Deterministic init mimicking PyTorch nn.Linear default (U[-1/sqrt(fan_in), +])."""
    ks = jax.random.split(key, 6)

    def lin(kw, kb, fan_in, fan_out):
        bound = 1.0 / jnp.sqrt(fan_in)
        w = jax.random.uniform(kw, (fan_in, fan_out), jnp.float32, -bound, bound)
        b = jax.random.uniform(kb, (1, fan_out), jnp.float32, -bound, bound)
        return w, b

    w1, b1 = lin(ks[0], ks[1], input_length, hidden)
    wv, bv = lin(ks[2], ks[3], hidden, 1)
    wpi, bpi = lin(ks[4], ks[5], hidden, action_length)
    return {"w1": w1, "b1": b1, "wv": wv, "bv": bv, "wpi": wpi, "bpi": bpi}


def prepare_params(params):
    """One-time layout/fusion transform of the raw (in, out)-layout params.

    Do this at init / parameter-update time, NOT per forward call.
    """
    w_heads = jnp.concatenate([params["wpi"], params["wv"]], axis=1)   # (H, A+1)
    b_heads = jnp.concatenate([params["bpi"], params["bv"]], axis=1)   # (1, A+1)
    return {
        "w1t": params["w1"].T,                     # (H, K)   f32
        "b1t": params["b1"].T,                     # (H, 1)   f32
        "whT": w_heads.T.astype(jnp.bfloat16),     # (A+1, H) bf16 (MXU operand)
        "bhT": b_heads.T,                          # (A+1, 1) f32
    }


def reference_forward(xs, params):
    h = jnp.maximum(xs @ params["w1"] + params["b1"], 0.0)
    vs = jnp.tanh(h @ params["wv"] + params["bv"])
    logits = h @ params["wpi"] + params["bpi"]
    pis = jax.nn.softmax(logits, axis=-1)
    return vs, pis


def _check(xs, params, prepared, action_length, **kw):
    vs, pis = alphazero_forward(xs, prepared, **kw)
    jax.block_until_ready((vs, pis))
    vs_ref, pis_ref = reference_forward(xs, params)
    assert vs.shape == (xs.shape[0], 1) and pis.shape == (xs.shape[0], action_length)
    # bf16 MXU operands -> relaxed tolerance vs the full-f32 reference.
    assert jnp.allclose(vs, vs_ref, atol=2e-2, rtol=2e-2)
    assert jnp.allclose(pis, pis_ref, atol=2e-2, rtol=2e-2)
    assert jnp.allclose(jnp.sum(pis, axis=-1), 1.0, atol=1e-4)


if __name__ == "__main__":
    key = jax.random.PRNGKey(0)
    k_x, k_p, k_x2 = jax.random.split(key, 3)

    input_length = 4     # Connect2 board has 4 positions
    action_length = 4    # one action per position
    params = init_params(k_p, input_length, action_length)
    prepared = prepare_params(params)   # fuse / transpose / bf16-cast ONCE

    # Small batch: single grid step, padded lane tile.
    xs = jax.random.normal(k_x, (8, input_length), dtype=jnp.float32)
    _check(xs, params, prepared, action_length)

    # Larger batch: several 128-wide grid steps + a padded tail (exercises the
    # tiling, multi-step "parallel" grid, and padding paths).
    xs2 = jax.random.normal(k_x2, (300, input_length), dtype=jnp.float32)
    _check(xs2, params, prepared, action_length, block_cols=128)

    print("KERNEL_OK")
</pallas_src>

<mosaic_0001>
module attributes {stable_mosaic.version = 11 : i64} {
  func.func @alphazero_kernel(%arg0: i32, %arg1: memref<4x128xf32, #tpu.memory_space<vmem>>, %arg2: memref<256x4xf32, #tpu.memory_space<vmem>>, %arg3: memref<256x1xf32, #tpu.memory_space<vmem>>, %arg4: memref<5x256xbf16, #tpu.memory_space<vmem>>, %arg5: memref<5x1xf32, #tpu.memory_space<vmem>>, %arg6: memref<5x128xf32, #tpu.memory_space<vmem>>) attributes {dimension_semantics = [#tpu.dimension_semantics<parallel>], iteration_bounds = array<i64: 1>, scalar_prefetch = 0 : i64, scratch_operands = 0 : i64, tpu.core_type = #tpu.core_type<tc>, window_params = [{transform_indices = @transform_0, window_bounds = array<i64: 4, 128>}, {pipeline_mode = #tpu.pipeline_mode<synchronous>, transform_indices = @transform_1, window_bounds = array<i64: 256, 4>}, {pipeline_mode = #tpu.pipeline_mode<synchronous>, transform_indices = @transform_2, window_bounds = array<i64: 256, 1>}, {pipeline_mode = #tpu.pipeline_mode<synchronous>, transform_indices = @transform_3, window_bounds = array<i64: 5, 256>}, {pipeline_mode = #tpu.pipeline_mode<synchronous>, transform_indices = @transform_4, window_bounds = array<i64: 5, 1>}, {transform_indices = @transform_5, window_bounds = array<i64: 5, 128>}]} {
    %c0 = arith.constant 0 : index
    %c0_0 = arith.constant 0 : index
    %0 = vector.load %arg2[%c0, %c0_0] : memref<256x4xf32, #tpu.memory_space<vmem>>, vector<256x1xf32>
    %c0_1 = arith.constant 0 : index
    %c0_2 = arith.constant 0 : index
    %1 = vector.load %arg1[%c0_1, %c0_2] : memref<4x128xf32, #tpu.memory_space<vmem>>, vector<1x128xf32>
    %2 = vector.broadcast %0 : vector<256x1xf32> to vector<256x128xf32>
    %3 = vector.broadcast %1 : vector<1x128xf32> to vector<256x128xf32>
    %4 = arith.mulf %2, %3 : vector<256x128xf32>
    %c0_3 = arith.constant 0 : index
    %c1 = arith.constant 1 : index
    %5 = vector.load %arg2[%c0_3, %c1] : memref<256x4xf32, #tpu.memory_space<vmem>>, vector<256x1xf32>
    %c1_4 = arith.constant 1 : index
    %c0_5 = arith.constant 0 : index
    %6 = vector.load %arg1[%c1_4, %c0_5] : memref<4x128xf32, #tpu.memory_space<vmem>>, vector<1x128xf32>
    %7 = vector.broadcast %5 : vector<256x1xf32> to vector<256x128xf32>
    %8 = vector.broadcast %6 : vector<1x128xf32> to vector<256x128xf32>
    %9 = arith.mulf %7, %8 : vector<256x128xf32>
    %10 = arith.addf %4, %9 : vector<256x128xf32>
    %c0_6 = arith.constant 0 : index
    %c2 = arith.constant 2 : index
    %11 = vector.load %arg2[%c0_6, %c2] : memref<256x4xf32, #tpu.memory_space<vmem>>, vector<256x1xf32>
    %c2_7 = arith.constant 2 : index
    %c0_8 = arith.constant 0 : index
    %12 = vector.load %arg1[%c2_7, %c0_8] : memref<4x128xf32, #tpu.memory_space<vmem>>, vector<1x128xf32>
    %13 = vector.broadcast %11 : vector<256x1xf32> to vector<256x128xf32>
    %14 = vector.broadcast %12 : vector<1x128xf32> to vector<256x128xf32>
    %15 = arith.mulf %13, %14 : vector<256x128xf32>
    %16 = arith.addf %10, %15 : vector<256x128xf32>
    %c0_9 = arith.constant 0 : index
    %c3 = arith.constant 3 : index
    %17 = vector.load %arg2[%c0_9, %c3] : memref<256x4xf32, #tpu.memory_space<vmem>>, vector<256x1xf32>
    %c3_10 = arith.constant 3 : index
    %c0_11 = arith.constant 0 : index
    %18 = vector.load %arg1[%c3_10, %c0_11] : memref<4x128xf32, #tpu.memory_space<vmem>>, vector<1x128xf32>
    %19 = vector.broadcast %17 : vector<256x1xf32> to vector<256x128xf32>
    %20 = vector.broadcast %18 : vector<1x128xf32> to vector<256x128xf32>
    %21 = arith.mulf %19, %20 : vector<256x128xf32>
    %22 = arith.addf %16, %21 : vector<256x128xf32>
    %c0_12 = arith.constant 0 : index
    %c0_13 = arith.constant 0 : index
    %23 = vector.load %arg3[%c0_12, %c0_13] : memref<256x1xf32, #tpu.memory_space<vmem>>, vector<256x1xf32>
    %24 = vector.broadcast %23 : vector<256x1xf32> to vector<256x128xf32>
    %25 = arith.addf %22, %24 : vector<256x128xf32>
    %cst = arith.constant 0.000000e+00 : f32
    %26 = vector.broadcast %cst : f32 to vector<256x128xf32>
    %27 = arith.maximumf %25, %26 : vector<256x128xf32>
    %c0_14 = arith.constant 0 : index
    %c0_15 = arith.constant 0 : index
    %28 = vector.load %arg4[%c0_14, %c0_15] : memref<5x256xbf16, #tpu.memory_space<vmem>>, vector<5x256xbf16>
    %29 = arith.truncf %27 : vector<256x128xf32> to vector<256x128xbf16>
    %cst_16 = arith.constant dense<0.000000e+00> : vector<5x128xf32>
    %30 = tpu.matmul %28, %29, %cst_16 {dimension_numbers = #tpu.dot_dimension_numbers<[1], [0], [0], [1], [0, 0, 1, 1], [], []>} : vector<5x256xbf16>, vector<256x128xbf16>, vector<5x128xf32> -> vector<5x128xf32>
    %c0_17 = arith.constant 0 : index
    %c0_18 = arith.constant 0 : index
    %31 = vector.load %arg5[%c0_17, %c0_18] : memref<5x1xf32, #tpu.memory_space<vmem>>, vector<5x1xf32>
    %32 = vector.broadcast %31 : vector<5x1xf32> to vector<5x128xf32>
    %33 = arith.addf %30, %32 : vector<5x128xf32>
    %34 = tpu.iota {dimensions = array<i32: 0>} : vector<5x128xi32>
    %c4_i32 = arith.constant 4 : i32
    %35 = vector.broadcast %c4_i32 : i32 to vector<5x128xi32>
    %36 = arith.cmpi eq, %34, %35 : vector<5x128xi32>
    %cst_19 = arith.constant 0xFF800000 : f32
    %37 = vector.broadcast %cst_19 : f32 to vector<5x128xf32>
    %38 = arith.select %36, %37, %33 : vector<5x128xi1>, vector<5x128xf32>
    %cst_20 = arith.constant dense<0xFF800000> : vector<128xf32>
    %39 = vector.multi_reduction <maximumf>, %38, %cst_20 [0] : vector<5x128xf32> to vector<128xf32>
    %40 = vector.shape_cast %39 : vector<128xf32> to vector<1x128xf32>
    %41 = vector.broadcast %40 : vector<1x128xf32> to vector<5x128xf32>
    %42 = arith.subf %38, %41 : vector<5x128xf32>
    %43 = math.exp %42 : vector<5x128xf32>
    %cst_21 = arith.constant dense<0.000000e+00> : vector<128xf32>
    %44 = vector.multi_reduction <add>, %43, %cst_21 [0] : vector<5x128xf32> to vector<128xf32>
    %45 = vector.shape_cast %44 : vector<128xf32> to vector<1x128xf32>
    %46 = tpu.reciprocal %45 : vector<1x128xf32> -> vector<1x128xf32>
    %47 = vector.broadcast %46 : vector<1x128xf32> to vector<5x128xf32>
    %48 = arith.mulf %43, %47 : vector<5x128xf32>
    %49 = math.tanh %33 : vector<5x128xf32>
    %50 = arith.select %36, %49, %48 : vector<5x128xi1>, vector<5x128xf32>
    %c0_22 = arith.constant 0 : index
    %c0_23 = arith.constant 0 : index
    %51 = vector.load %arg6[%c0_22, %c0_23] : memref<5x128xf32, #tpu.memory_space<vmem>>, vector<5x128xf32>
    tpu.vector_store %arg6[%c0_22, %c0_23], %50 {strides = array<i32>} : memref<5x128xf32, #tpu.memory_space<vmem>>, vector<5x128xf32>,
    return
  }
  func.func @transform_0(%arg0: i32) -> (i32, i32) {
    %c0_i32 = arith.constant 0 : i32
    %c0_i32_0 = arith.constant 0 : i32
    return %c0_i32, %arg0 : i32, i32
  }
  func.func @transform_1(%arg0: i32) -> (i32, i32) {
    %c0_i32 = arith.constant 0 : i32
    %c0_i32_0 = arith.constant 0 : i32
    %c0_i32_1 = arith.constant 0 : i32
    return %c0_i32, %c0_i32_0 : i32, i32
  }
  func.func @transform_2(%arg0: i32) -> (i32, i32) {
    %c0_i32 = arith.constant 0 : i32
    %c0_i32_0 = arith.constant 0 : i32
    %c0_i32_1 = arith.constant 0 : i32
    return %c0_i32, %c0_i32_0 : i32, i32
  }
  func.func @transform_3(%arg0: i32) -> (i32, i32) {
    %c0_i32 = arith.constant 0 : i32
    %c0_i32_0 = arith.constant 0 : i32
    %c0_i32_1 = arith.constant 0 : i32
    return %c0_i32, %c0_i32_0 : i32, i32
  }
  func.func @transform_4(%arg0: i32) -> (i32, i32) {
    %c0_i32 = arith.constant 0 : i32
    %c0_i32_0 = arith.constant 0 : i32
    %c0_i32_1 = arith.constant 0 : i32
    return %c0_i32, %c0_i32_0 : i32, i32
  }
  func.func @transform_5(%arg0: i32) -> (i32, i32) {
    %c0_i32 = arith.constant 0 : i32
    %c0_i32_0 = arith.constant 0 : i32
    return %c0_i32, %arg0 : i32, i32
  }
}

</mosaic_0001>

<bundles_post_ra>
// kernel: tpu_custom_call.1
= control target key start
LH: loop header
LB: loop body
LE: loop exit
PB: predicated region body
PF: predicated region fallthrough
CT: control target
= control target key end

     0   :  { %v1264_v3 = vmov 1   ;;  %v2227_v4 = vmov 0   ;;  %s2219_s0 = inlined_call_operand.vmem [shape: f32[4,128], index: 0, kind: input, shape index: {}]   ;;  %s2220_s1 = inlined_call_operand.vmem [shape: f32[256,4], index: 1, kind: input, shape index: {}]   ;;  %s2221_s2 = inlined_call_operand.vmem [shape: f32[256,1], index: 2, kind: input, shape index: {}]   ;;  %s2222_s3 = inlined_call_operand.vmem [shape: bf16[5,256], index: 3, kind: input, shape index: {}]   ;;  %s2223_s4 = inlined_call_operand.vmem [shape: f32[5,1], index: 4, kind: input, shape index: {}]   ;;  %s2224_s5 = inlined_call_operand.hbm [shape: f32[5,128], index: 5, kind: output, shape index: {}]  }
   0x1   :  { %v1302_v0 = vld [vmem:[%s2220_s1 + $0x20] sm:$0xff]  ;;  %v1307_v1 = vld [vmem:[%s2220_s1 + $0x10] sm:$0xff]  ;;  %v1312_v2 = vld [vmem:[%s2220_s1 + $0x8] sm:$0xff]  ;;  %1205 = vset.pattern.permute.xlu0 %v1264_v3  ;;  %1203 = vset.pattern.permute.xlu2 %v2227_v4 }
   0x2   :  { %1202 = vset.pattern.permute.xlu1 %v2227_v4  ;;  %76 = vperm.xlu2 %1203, %v1302_v0  }
   0x3   :  { %66 = vperm.xlu1 %1202, %v1307_v1   ;;  %253 = vperm.xlu0 %1205, %v1312_v2  }
   0x4   :  { %10 = vsyncpa [#allocation3], 0  ;;  %v1323_v5 = vld [vmem:[%s2220_s1 + $0x28] sm:$0xff]  ;;  %v1328_v6 = vld [vmem:[%s2220_s1 + $0x18] sm:$0xff]  ;;  %v1266_v34 = vmov 2   ;;  %v2225_v56 = vmov 3  }
   0x5   :  { %v1333_v7 = vld [vmem:[%s2220_s1 + $0x30] sm:$0xff]  ;;  %v1341_v8 = vld [vmem:[%s2220_s1 + $0x40] sm:$0xff]  ;;  %v1346_v9 = vld [vmem:[%s2220_s1 + $0x38] sm:$0xff]  ;;  %vm1145_vm1 = vcmask 1044480   ;;  %s1188_s29 = sshll.u32 %s2224_s5, 4  ;;  %s1189_s29 = int_to_ptr.hbm [resolvable:$true] %s1188_s29 }
   0x6   :  { %v1351_v10 = vld [vmem:[%s2220_s1 + $0x48] sm:$0xff]  ;;  %v1359_v11 = vld [vmem:[%s2220_s1 + $0x58] sm:$0xff]  ;;  %v1364_v12 = vld [vmem:[%s2220_s1 + $0x50] sm:$0xff] }
   0x7   :  { %v1369_v13 = vld [vmem:[%s2220_s1 + $0x60] sm:$0xff]  ;;  %v1377_v14 = vld [vmem:[%s2220_s1 + $0x70] sm:$0xff]  ;;  %v1382_v15 = vld [vmem:[%s2220_s1 + $0x68] sm:$0xff] }
   0x8   :  { %v1387_v16 = vld [vmem:[%s2220_s1 + $0x78] sm:$0xff]  ;;  %v1395_v17 = vld [vmem:[%s2220_s1 + $0x88] sm:$0xff]  ;;  %v1400_v18 = vld [vmem:[%s2220_s1 + $0x80] sm:$0xff] }
   0x9   :  { %2235 = vst [vmem:[#allocation5_spill] sm:$0xff] %v1395_v17  ;;  %v1405_v19 = vld [vmem:[%s2220_s1 + $0x90] sm:$0xff]  ;;  %v1413_v20 = vld [vmem:[%s2220_s1 + $0xa0] sm:$0xff]  ;;  %v1418_v21 = vld [vmem:[%s2220_s1 + $0x98] sm:$0xff] }
   0xa   :  { %81 = vperm.xlu2 %1203, %v1323_v5   ;;  %2236 = vst [vmem:[#allocation6_spill] sm:$0xff] %v1413_v20  ;;  %v1423_v22 = vld [vmem:[%s2220_s1 + $0xa8] sm:$0xff]  ;;  %v1431_v23 = vld [vmem:[%s2220_s1 + $0xb8] sm:$0xff]  ;;  %v1436_v24 = vld [vmem:[%s2220_s1 + $0xb0] sm:$0xff] }
   0xb   :  { %71 = vperm.xlu1 %1202, %v1328_v6   ;;  %273 = vperm.xlu0 %1205, %v1333_v7   ;;  %2237 = vst [vmem:[#allocation7_spill] sm:$0xff] %v1418_v21  ;;  %v1441_v25 = vld [vmem:[%s2220_s1 + $0xc0] sm:$0xff]  ;;  %v1449_v26 = vld [vmem:[%s2220_s1 + $0xd0] sm:$0xff]  ;;  %v1454_v27 = vld [vmem:[%s2220_s1 + $0xc8] sm:$0xff] }
   0xc   :  { %2238 = vst [vmem:[#allocation8_spill] sm:$0xff] %v1431_v23  ;;  %v1459_v28 = vld [vmem:[%s2220_s1 + $0xd8] sm:$0xff]  ;;  %v1467_v29 = vld [vmem:[%s2220_s1 + $0xe8] sm:$0xff]  ;;  %v1472_v30 = vld [vmem:[%s2220_s1 + $0xe0] sm:$0xff] }
   0xd   :  { %2239 = vst [vmem:[#allocation9_spill] sm:$0xff] %v1436_v24  ;;  %v1477_v31 = vld [vmem:[%s2220_s1 + $0xf0] sm:$0xff]  ;;  %v1485_v32 = vld [vmem:[%s2220_s1 + $0xf8] sm:$0xff]  ;;  %v1490_v33 = vld [vmem:[%s2220_s1] sm:$0xff] }
   0xe   :  { %2240 = vst [vmem:[#allocation10_spill] sm:$0xff] %v1477_v31 }
  0x12   :  { %96 = vperm.xlu2 %1203, %v1341_v8  }
  0x13   :  { %91 = vperm.xlu1 %1202, %v1346_v9   ;;  %285 = vperm.xlu0 %1205, %v1351_v10  }
  0x1a   :  { %111 = vperm.xlu2 %1203, %v1359_v11  }
  0x1b   :  { %106 = vperm.xlu1 %1202, %v1364_v12   ;;  %297 = vperm.xlu0 %1205, %v1369_v13  }
  0x22   :  { %126 = vperm.xlu2 %1203, %v1377_v14  }
  0x23   :  { %121 = vperm.xlu1 %1202, %v1382_v15   ;;  %309 = vperm.xlu0 %1205, %v1387_v16  }
  0x2a   :  { %141 = vperm.xlu2 %1203, %v1395_v17  }
  0x2b   :  { %136 = vperm.xlu1 %1202, %v1400_v18   ;;  %321 = vperm.xlu0 %1205, %v1405_v19  }
  0x32   :  { %156 = vperm.xlu2 %1203, %v1413_v20  }
  0x33   :  { %151 = vperm.xlu1 %1202, %v1418_v21   ;;  %333 = vperm.xlu0 %1205, %v1423_v22  }
  0x3a   :  { %171 = vperm.xlu2 %1203, %v1431_v23  }
  0x3b   :  { %166 = vperm.xlu1 %1202, %v1436_v24   ;;  %345 = vperm.xlu0 %1205, %v1441_v25  }
  0x42   :  { %186 = vperm.xlu2 %1203, %v1449_v26  }
  0x43   :  { %181 = vperm.xlu1 %1202, %v1454_v27   ;;  %357 = vperm.xlu0 %1205, %v1459_v28  }
  0x4a   :  { %201 = vperm.xlu2 %1203, %v1467_v29  }
  0x4b   :  { %196 = vperm.xlu1 %1202, %v1472_v30   ;;  %369 = vperm.xlu0 %1205, %v1477_v31  }
  0x52   :  { %1204 = vset.pattern.permute.xlu2 %v1264_v3 }
  0x53   :  { %211 = vperm.xlu1 %1202, %v1485_v32   ;;  %1208 = vset.pattern.permute.xlu0 %v1266_v34 }
  0x54   :  { %447 = vperm.xlu0 %1208, %v1312_v2   ;;  %249 = vperm.xlu2 %1204, %v1490_v33  }
  0x5b   :  { %1206 = vset.pattern.permute.xlu1 %v1264_v3 }
  0x5c   :  { %257 = vperm.xlu1 %1206, %v1307_v1   ;;  %467 = vperm.xlu0 %1208, %v1333_v7   ;;  %v1500_v35 = vpop.permute.xlu2 %76 }
  0x5d   :  { %261 = vperm.xlu2 %1204, %v1328_v6  }
  0x64   :  { %265 = vperm.xlu1 %1206, %v1302_v0   ;;  %479 = vperm.xlu0 %1208, %v1351_v10   ;;  %v1505_v36 = vpop.permute.xlu2 %81 }
  0x65   :  { %269 = vperm.xlu2 %1204, %v1323_v5  }
  0x6c   :  { %277 = vperm.xlu1 %1206, %v1346_v9   ;;  %491 = vperm.xlu0 %1208, %v1369_v13   ;;  %v1510_v37 = vpop.permute.xlu2 %96 }
  0x6d   :  { %281 = vperm.xlu2 %1204, %v1341_v8  }
  0x74   :  { %289 = vperm.xlu1 %1206, %v1364_v12   ;;  %503 = vperm.xlu0 %1208, %v1387_v16   ;;  %v1515_v38 = vpop.permute.xlu2 %111 }
  0x75   :  { %293 = vperm.xlu2 %1204, %v1359_v11   ;;  %v1518_v39 = vpop.permute.xlu1 %66  ;;  %v1520_v40 = vpop.permute.xlu0 %253 }
  0x76   :  { %2241 = vst [vmem:[#allocation11_spill] sm:$0xff] %v1520_v40 }
  0x7c   :  { %301 = vperm.xlu1 %1206, %v1382_v15   ;;  %515 = vperm.xlu0 %1208, %v1405_v19   ;;  %v1524_v41 = vpop.permute.xlu2 %126 }
  0x7d   :  { %305 = vperm.xlu2 %1204, %v1377_v14   ;;  %v1527_v42 = vpop.permute.xlu1 %71  ;;  %v1529_v43 = vpop.permute.xlu0 %273 }
  0x7e   :  { %2242 = vst [vmem:[#allocation12_spill] sm:$0xff] %v1529_v43 }
  0x84   :  { %313 = vperm.xlu1 %1206, %v1400_v18   ;;  %527 = vperm.xlu0 %1208, %v1423_v22   ;;  %v1533_v44 = vpop.permute.xlu2 %141 }
  0x85   :  { %2243 = vst [vmem:[#allocation13_spill] sm:$0xff] %v1533_v44  ;;  %317 = vperm.xlu2 %1204, %v1395_v17   ;;  %v1536_v45 = vpop.permute.xlu1 %91  ;;  %v1538_v46 = vpop.permute.xlu0 %285 }
  0x86   :  { %2244 = vst [vmem:[#allocation14_spill] sm:$0xff] %v1538_v46 }
  0x8c   :  { %325 = vperm.xlu1 %1206, %v1418_v21   ;;  %539 = vperm.xlu0 %1208, %v1441_v25   ;;  %v1542_v47 = vpop.permute.xlu2 %156 }
  0x8d   :  { %329 = vperm.xlu2 %1204, %v1413_v20   ;;  %v1545_v48 = vpop.permute.xlu1 %106  ;;  %v1547_v49 = vpop.permute.xlu0 %297 }
  0x8e   :  { %2245 = vst [vmem:[#allocation15_spill] sm:$0xff] %v1545_v48 }
  0x8f   :  { %2246 = vst [vmem:[#allocation16_spill] sm:$0xff] %v1547_v49 }
  0x94   :  { %337 = vperm.xlu1 %1206, %v1436_v24   ;;  %551 = vperm.xlu0 %1208, %v1459_v28   ;;  %v1551_v50 = vpop.permute.xlu2 %171 }
  0x95   :  { %341 = vperm.xlu2 %1204, %v1431_v23   ;;  %v1554_v51 = vpop.permute.xlu1 %121  ;;  %v1556_v52 = vpop.permute.xlu0 %309 }
  0x96   :  { %2247 = vst [vmem:[#allocation17_spill] sm:$0xff] %v1554_v51 }
  0x97   :  { %2248 = vst [vmem:[#allocation18_spill] sm:$0xff] %v1556_v52 }
  0x9c   :  { %349 = vperm.xlu1 %1206, %v1454_v27   ;;  %563 = vperm.xlu0 %1208, %v1477_v31   ;;  %v1560_v53 = vpop.permute.xlu2 %186 }
  0x9d   :  { %353 = vperm.xlu2 %1204, %v1449_v26   ;;  %v1563_v54 = vpop.permute.xlu1 %136  ;;  %v1565_v55 = vpop.permute.xlu0 %321 }
  0x9e   :  { %2249 = vst [vmem:[#allocation19_spill] sm:$0xff] %v1563_v54 }
  0x9f   :  { %2250 = vst [vmem:[#allocation20_spill] sm:$0xff] %v1565_v55 }
  0xa4   :  { %361 = vperm.xlu1 %1206, %v1472_v30   ;;  %1211 = vset.pattern.permute.xlu0 %v2225_v56  ;;  %v1569_v57 = vpop.permute.xlu2 %201 }
  0xa5   :  { %365 = vperm.xlu2 %1204, %v1467_v29   ;;  %v1572_v58 = vpop.permute.xlu1 %151  ;;  %641 = vperm.xlu0 %1211, %v1312_v2   ;;  %v1575_v59 = vpop.permute.xlu0 %333 }
  0xa6   :  { %2251 = vst [vmem:[#allocation21_spill] sm:$0xff] %v1572_v58  ;;  %v1652_v58 = vld [vmem:[%s2219_s0 + $0x1] ss:$0 sm:$0xff] }
  0xa7   :  { %2252 = vst [vmem:[#allocation22_spill] sm:$0xff] %v1575_v59 }
  0xac   :  { %373 = vperm.xlu1 %1206, %v1485_v32  }
  0xad   :  { %1207 = vset.pattern.permute.xlu2 %v1266_v34  ;;  %v1579_v60 = vpop.permute.xlu1 %166  ;;  %661 = vperm.xlu0 %1211, %v1333_v7   ;;  %v1582_v61 = vpop.permute.xlu0 %345 }
  0xae   :  { %2253 = vst [vmem:[#allocation23_spill] sm:$0xff] %v1582_v61  ;;  %443 = vperm.xlu2 %1207, %v1490_v33   ;;  %v1585_v62 = vpop.permute.xlu2 %249 }
  0xaf   :  { %2254 = vst [vmem:[#allocation24_spill] sm:$0xff] %v1585_v62 }
  0xb4   :  { %1209 = vset.pattern.permute.xlu1 %v1266_v34 }
  0xb5   :  { %451 = vperm.xlu1 %1209, %v1307_v1   ;;  %v1589_v63 = vpop.permute.xlu1 %181  ;;  %673 = vperm.xlu0 %1211, %v1351_v10   ;;  %v1592_v3 = vpop.permute.xlu0 %357 }
  0xb6   :  { %2255 = vst [vmem:[#allocation25_spill] sm:$0xff] %v1592_v3  ;;  %455 = vperm.xlu2 %1207, %v1328_v6  }
  0xb7   :  { %v1595_v56 = vpop.permute.xlu2 %261 }
  0xbd   :  { %459 = vperm.xlu1 %1209, %v1302_v0   ;;  %v1598_v4 = vpop.permute.xlu1 %196  ;;  %685 = vperm.xlu0 %1211, %v1369_v13   ;;  %v1601_v61 = vpop.permute.xlu0 %369 }
  0xbe   :  { %2256 = vst [vmem:[#allocation26_spill] sm:$0xff] %v1601_v61  ;;  %463 = vperm.xlu2 %1207, %v1323_v5  }
  0xbf   :  { %v1604_v34 = vpop.permute.xlu2 %269 }
  0xc5   :  { %471 = vperm.xlu1 %1209, %v1346_v9   ;;  %v1607_v59 = vpop.permute.xlu1 %211  ;;  %697 = vperm.xlu0 %1211, %v1387_v16  }
  0xc6   :  { %475 = vperm.xlu2 %1207, %v1341_v8   ;;  %v1611_v3 = vpop.permute.xlu0 %447 }
  0xc7   :  { %2257 = vst [vmem:[#allocation27_spill] sm:$0xff] %v1611_v3  ;;  %v1613_v55 = vpop.permute.xlu2 %281 }
  0xcd   :  { %483 = vperm.xlu1 %1209, %v1364_v12   ;;  %709 = vperm.xlu0 %1211, %v1405_v19  }
  0xce   :  { %487 = vperm.xlu2 %1207, %v1359_v11   ;;  %v1618_v61 = vpop.permute.xlu1 %257  ;;  %v1620_v52 = vpop.permute.xlu0 %467 }
  0xcf   :  { %2258 = vst [vmem:[#allocation28_spill] sm:$0xff] %v1620_v52  ;;  %v1622_v49 = vpop.permute.xlu2 %293 }
  0xd5   :  { %495 = vperm.xlu1 %1209, %v1382_v15   ;;  %757 = vperm.xlu0 %1211, %v1477_v31  }
  0xd6   :  { %499 = vperm.xlu2 %1207, %v1377_v14   ;;  %v1627_v46 = vpop.permute.xlu1 %265  ;;  %v1629_v43 = vpop.permute.xlu0 %479 }
  0xd7   :  { %2259 = vst [vmem:[#allocation29_spill] sm:$0xff] %v1629_v43  ;;  %v1631_v3 = vpop.permute.xlu2 %305  ;;  %v1647_v43 = vld [vmem:[%s2219_s0] ss:$0 sm:$0xff] }
  0xd8   :  { %v235_v31 = vmul.f32 %v1647_v43, %v1542_v47  ;;  %v238_v47 = vmul.f32 %v1647_v43, %v1551_v50 }
  0xdd   :  { %507 = vperm.xlu1 %1209, %v1400_v18   ;;  %745 = vperm.xlu0 %1211, %v1459_v28  }
  0xde   :  { %511 = vperm.xlu2 %1207, %v1395_v17   ;;  %v1636_v52 = vpop.permute.xlu1 %277  ;;  %v1638_v40 = vpop.permute.xlu0 %491  ;;  %v2262_v17 = vmov 0  }
  0xdf   :  { %2260 = vst [vmem:[#allocation30_spill] sm:$0xff] %v1638_v40  ;;  %v1640_v62 = vpop.permute.xlu2 %317 }
  0xe5   :  { %519 = vperm.xlu1 %1209, %v1418_v21   ;;  %733 = vperm.xlu0 %1211, %v1441_v25  }
  0xe6   :  { %523 = vperm.xlu2 %1207, %v1413_v20   ;;  %v1655_v54 = vpop.permute.xlu1 %289  ;;  %v1657_v40 = vpop.permute.xlu0 %503 }
  0xe7   :  { %2261 = vst [vmem:[#allocation31_spill] sm:$0xff] %v1657_v40  ;;  %v330_v51 = vpop.permute.xlu2 %329 }
  0xe8   :  { %v397_v21 = vmul.f32 %v1652_v58, %v330_v51 }
  0xea   :  { %v1662_v48 = vadd.f32 %v397_v21, %v235_v31 }
  0xed   :  { %531 = vperm.xlu1 %1209, %v1436_v24   ;;  %1219 = vset.pattern.permute.xlu0 %v2262_v17  ;;  %v241_v24 = vmul.f32 %v1647_v43, %v1560_v53 }
  0xee   :  { %535 = vperm.xlu2 %1207, %v1431_v23   ;;  %v1667_v44 = vpop.permute.xlu1 %301  ;;  %v1669_v20 = vpop.permute.xlu0 %515  ;;  %56 = vperm.xlu0 %1219, %v1490_v33  }
  0xef   :  { %2263 = vst [vmem:[#allocation32_spill] sm:$0xff] %v1669_v20  ;;  %v342_v40 = vpop.permute.xlu2 %341 }
  0xf0   :  { %v400_v51 = vmul.f32 %v1652_v58, %v342_v40 }
  0xf2   :  { %v1675_v21 = vadd.f32 %v400_v51, %v238_v47 }
  0xf5   :  { %543 = vperm.xlu1 %1209, %v1454_v27  }
  0xf6   :  { %547 = vperm.xlu2 %1207, %v1449_v26   ;;  %v1679_v31 = vpop.permute.xlu1 %313  ;;  %v1681_v23 = vpop.permute.xlu0 %527  ;;  %61 = vperm.xlu0 %1219, %v1312_v2   ;;  %v244_v2 = vmul.f32 %v1647_v43, %v1569_v57 }
  0xf7   :  { %2264 = vst [vmem:[#allocation33_spill] sm:$0xff] %v1681_v23  ;;  %v354_v20 = vpop.permute.xlu2 %353 }
  0xf8   :  { %v403_v50 = vmul.f32 %v1652_v58, %v354_v20  ;;  %v2266_v20 = vmov 3  }
  0xfa   :  { %v1687_v17 = vadd.f32 %v403_v50, %v241_v24 }
  0xfd   :  { %555 = vperm.xlu1 %1209, %v1472_v30  }
  0xfe   :  { %559 = vperm.xlu2 %1207, %v1467_v29   ;;  %v1691_v40 = vpop.permute.xlu1 %325  ;;  %v1693_v47 = vpop.permute.xlu0 %539  ;;  %86 = vperm.xlu0 %1219, %v1333_v7   ;;  %v237_v7 = vmul.f32 %v1647_v43, %v1579_v60  ;;  %v218_v60 = vmul.f32 %v1647_v43, %v1527_v42  ;;  %v382_v42 = vmul.f32 %v1652_v58, %v1604_v34 }
  0xff   :  { %2265 = vst [vmem:[#allocation34_spill] sm:$0xff] %v1693_v47  ;;  %v366_v51 = vpop.permute.xlu2 %365 }
 0x100   :  { %v406_v53 = vmul.f32 %v1652_v58, %v366_v51 }
 0x102   :  { %v1699_v23 = vadd.f32 %v406_v53, %v244_v2  ;;  %v380_v2 = vmul.f32 %v1652_v58, %v1595_v56 }
 0x105   :  { %567 = vperm.xlu1 %1209, %v1485_v32  }
 0x106   :  { %1210 = vset.pattern.permute.xlu2 %v2266_v20  ;;  %v338_v24 = vpop.permute.xlu1 %337  ;;  %v1703_v50 = vpop.permute.xlu0 %551  ;;  %101 = vperm.xlu0 %1219, %v1351_v10  }
 0x107   :  { %v399_v47 = vmul.f32 %v1652_v58, %v338_v24  ;;  %637 = vperm.xlu2 %1210, %v1490_v33   ;;  %v240_v33 = vmul.f32 %v1647_v43, %v1589_v63  ;;  %v412_v24 = vadd.f32 %v380_v2, %v218_v60 }
 0x108   :  { %v1710_v57 = vpop.permute.xlu2 %443 }
 0x109   :  { %v1712_v51 = vadd.f32 %v399_v47, %v237_v7  ;;  %v1728_v47 = vld [vmem:[%s2219_s0 + $0x2] ss:$0 sm:$0xff] }
 0x10d   :  { %1212 = vset.pattern.permute.xlu1 %v2266_v20 }
 0x10e   :  { %645 = vperm.xlu1 %1212, %v1307_v1   ;;  %v350_v53 = vpop.permute.xlu1 %349  ;;  %v1718_v10 = vpop.permute.xlu0 %563  ;;  %116 = vperm.xlu0 %1219, %v1369_v13  }
 0x10f   :  { %2267 = vst [vmem:[#allocation35_spill] sm:$0xff] %v1718_v10  ;;  %v402_v56 = vmul.f32 %v1652_v58, %v350_v53  ;;  %649 = vperm.xlu2 %1210, %v1328_v6   ;;  %v220_v53 = vmul.f32 %v1647_v43, %v1505_v36  ;;  %v243_v6 = vmul.f32 %v1647_v43, %v1598_v4 }
 0x110   :  { %v456_v1 = vpop.permute.xlu2 %455  ;;  %v246_v36 = vmul.f32 %v1647_v43, %v1607_v59  ;;  %v217_v59 = vmul.f32 %v1647_v43, %v1518_v39 }
 0x111   :  { %v1732_v7 = vadd.f32 %v402_v56, %v240_v33  ;;  %v574_v13 = vmul.f32 %v1728_v47, %v456_v1  ;;  %v414_v56 = vadd.f32 %v382_v42, %v220_v53 }
 0x113   :  { %v1735_v10 = vadd.f32 %v574_v13, %v412_v24 }
 0x116   :  { %653 = vperm.xlu1 %1212, %v1302_v0   ;;  %v362_v63 = vpop.permute.xlu1 %361  ;;  %131 = vperm.xlu0 %1219, %v1387_v16   ;;  %v385_v16 = vmul.f32 %v1652_v58, %v1613_v55 }
 0x117   :  { %v405_v2 = vmul.f32 %v1652_v58, %v362_v63  ;;  %657 = vperm.xlu2 %1210, %v1323_v5   ;;  %v1747_v60 = vpop.permute.xlu0 %641  ;;  %v223_v5 = vmul.f32 %v1647_v43, %v1510_v37  ;;  %v388_v37 = vmul.f32 %v1652_v58, %v1622_v49 }
 0x118   :  { %v464_v33 = vpop.permute.xlu2 %463 }
 0x119   :  { %v1749_v34 = vadd.f32 %v405_v2, %v243_v6  ;;  %v576_v0 = vmul.f32 %v1728_v47, %v464_v33  ;;  %v417_v63 = vadd.f32 %v385_v16, %v223_v5  ;;  %v381_v16 = vmul.f32 %v1652_v58, %v1627_v46 }
 0x11b   :  { %v1752_v1 = vadd.f32 %v576_v0, %v414_v56 }
 0x11e   :  { %665 = vperm.xlu1 %1212, %v1346_v9   ;;  %v374_v4 = vpop.permute.xlu1 %373  ;;  %146 = vperm.xlu0 %1219, %v1405_v19   ;;  %v379_v19 = vmul.f32 %v1652_v58, %v1618_v61 }
 0x11f   :  { %v408_v24 = vmul.f32 %v1652_v58, %v374_v4  ;;  %669 = vperm.xlu2 %1210, %v1341_v8   ;;  %v1764_v13 = vpop.permute.xlu0 %661  ;;  %v226_v8 = vmul.f32 %v1647_v43, %v1515_v38  ;;  %v219_v38 = vmul.f32 %v1647_v43, %v1500_v35  ;;  %v229_v4 = vmul.f32 %v1647_v43, %v1524_v41 }
 0x120   :  { %v476_v42 = vpop.permute.xlu2 %475  ;;  %v411_v33 = vadd.f32 %v379_v19, %v217_v59  ;;  %v222_v41 = vmul.f32 %v1647_v43, %v1536_v45 }
 0x121   :  { %v1766_v55 = vadd.f32 %v408_v24, %v246_v36  ;;  %v579_v9 = vmul.f32 %v1728_v47, %v476_v42  ;;  %v420_v49 = vadd.f32 %v388_v37, %v226_v8  ;;  %v413_v24 = vadd.f32 %v381_v16, %v219_v38  ;;  %v2269_v37 = vld [vmem:[#allocation5_spill] sm:$0xff]  ;;  %v2272_v16 = vld [vmem:[#allocation10_spill] sm:$0xff] }
 0x123   :  { %v1769_v53 = vadd.f32 %v579_v9, %v417_v63  ;;  %v2268_v9 = vld [vmem:[#allocation13_spill] sm:$0xff] }
 0x124   :  { %v232_v19 = vmul.f32 %v1647_v43, %v2268_v9 }
 0x126   :  { %677 = vperm.xlu1 %1212, %v1364_v12   ;;  %161 = vperm.xlu0 %1219, %v1423_v22  }
 0x127   :  { %681 = vperm.xlu2 %1210, %v1359_v11   ;;  %v452_v6 = vpop.permute.xlu1 %451  ;;  %v1782_v2 = vpop.permute.xlu0 %673  ;;  %v391_v11 = vmul.f32 %v1652_v58, %v1631_v3 }
 0x128   :  { %v573_v61 = vmul.f32 %v1728_v47, %v452_v6  ;;  %v488_v56 = vpop.permute.xlu2 %487 }
 0x129   :  { %v582_v0 = vmul.f32 %v1728_v47, %v488_v56  ;;  %v423_v3 = vadd.f32 %v391_v11, %v229_v4  ;;  %v2270_v56 = vld [vmem:[#allocation15_spill] sm:$0xff]  ;;  %v2273_v11 = vld [vmem:[#allocation6_spill] sm:$0xff] }
 0x12a   :  { %v1786_v39 = vadd.f32 %v573_v61, %v411_v33 }
 0x12b   :  { %v1788_v12 = vadd.f32 %v582_v0, %v420_v49  ;;  %v225_v49 = vmul.f32 %v1647_v43, %v2270_v56  ;;  %v2271_v0 = vld [vmem:[#allocation7_spill] sm:$0xff] }
 0x12e   :  { %689 = vperm.xlu1 %1212, %v1382_v15   ;;  %176 = vperm.xlu0 %1219, %v1441_v25   ;;  %v384_v25 = vmul.f32 %v1652_v58, %v1636_v52 }
 0x12f   :  { %693 = vperm.xlu2 %1210, %v1377_v14   ;;  %v460_v5 = vpop.permute.xlu1 %459  ;;  %v1801_v36 = vpop.permute.xlu0 %685  ;;  %v394_v14 = vmul.f32 %v1652_v58, %v1640_v62 }
 0x130   :  { %v575_v46 = vmul.f32 %v1728_v47, %v460_v5  ;;  %v500_v42 = vpop.permute.xlu2 %499  ;;  %v416_v6 = vadd.f32 %v384_v25, %v222_v41  ;;  %v390_v25 = vmul.f32 %v1652_v58, %v1667_v44  ;;  %v2274_v41 = vld [vmem:[#allocation17_spill] sm:$0xff] }
 0x131   :  { %v585_v63 = vmul.f32 %v1728_v47, %v500_v42  ;;  %v426_v62 = vadd.f32 %v394_v14, %v232_v19  ;;  %v843_v14 = vld [vmem:[%s2221_s2 + $0x70] sm:$0xff]  ;;  %v228_v9 = vmul.f32 %v1647_v43, %v2274_v41  ;;  %v2275_v19 = vmov 0  }
 0x132   :  { %v1805_v35 = vadd.f32 %v575_v46, %v413_v24 }
 0x133   :  { %v1807_v15 = vadd.f32 %v585_v63, %v423_v3  ;;  %v844_v63 = vld [vmem:[%s2221_s2 + $0x78] sm:$0xff] }
 0x136   :  { %701 = vperm.xlu1 %1212, %v1400_v18   ;;  %191 = vperm.xlu0 %1219, %v1459_v28   ;;  %v387_v28 = vmul.f32 %v1652_v58, %v1655_v54 }
 0x137   :  { %705 = vperm.xlu2 %1210, %v2269_v37   ;;  %v472_v59 = vpop.permute.xlu1 %471  ;;  %v1820_v8 = vpop.permute.xlu0 %697 }
 0x138   :  { %v578_v52 = vmul.f32 %v1728_v47, %v472_v59  ;;  %v512_v33 = vpop.permute.xlu2 %511  ;;  %v419_v5 = vadd.f32 %v387_v28, %v225_v49  ;;  %v422_v59 = vadd.f32 %v390_v25, %v228_v9  ;;  %v2276_v28 = vld [vmem:[#allocation19_spill] sm:$0xff] }
 0x139   :  { %v588_v61 = vmul.f32 %v1728_v47, %v512_v33  ;;  %v231_v56 = vmul.f32 %v1647_v43, %v2276_v28  ;;  %v860_v25 = vld [vmem:[%s2221_s2 + $0xf8] sm:$0xff]  ;;  %v2278_v28 = vld [vmem:[#allocation24_spill] sm:$0xff] }
 0x13a   :  { %v1824_v45 = vadd.f32 %v578_v52, %v416_v6 }
 0x13b   :  { %v1826_v18 = vadd.f32 %v588_v61, %v426_v62  ;;  %v393_v61 = vmul.f32 %v1652_v58, %v1679_v31 }
 0x13e   :  { %713 = vperm.xlu1 %1212, %v2271_v0   ;;  %206 = vperm.xlu0 %1219, %v2272_v16   ;;  %v425_v16 = vadd.f32 %v393_v61, %v231_v56  ;;  %v377_v56 = vmul.f32 %v1652_v58, %v2278_v28  ;;  %v839_v28 = vld [vmem:[%s2221_s2 + $0x50] sm:$0xff] }
 0x13f   :  { %717 = vperm.xlu2 %1210, %v2273_v11   ;;  %v484_v38 = vpop.permute.xlu1 %483  ;;  %v1835_v4 = vpop.permute.xlu0 %709 }
 0x140   :  { %v581_v24 = vmul.f32 %v1728_v47, %v484_v38  ;;  %v524_v46 = vpop.permute.xlu2 %523 }
 0x141   :  { %v591_v42 = vmul.f32 %v1728_v47, %v524_v46  ;;  %v859_v46 = vld [vmem:[%s2221_s2 + $0xf0] sm:$0xff] }
 0x142   :  { %v1839_v3 = vadd.f32 %v581_v24, %v419_v5  ;;  %v396_v24 = vmul.f32 %v1652_v58, %v1691_v40 }
 0x143   :  { %v1842_v54 = vadd.f32 %v591_v42, %v1662_v48  ;;  %v2277_v42 = vld [vmem:[#allocation21_spill] sm:$0xff] }
 0x146   :  { %761 = vperm.xlu1 %1212, %v1485_v32   ;;  %938 = vperm.xlu0 %1219, %v844_v63   ;;  %v841_v32 = vld [vmem:[%s2221_s2 + $0x60] sm:$0xff]  ;;  %v234_v63 = vmul.f32 %v1647_v43, %v2277_v42 }
 0x147   :  { %1213 = vset.pattern.permute.xlu2 %v2275_v19  ;;  %v496_v48 = vpop.permute.xlu1 %495  ;;  %v1856_v37 = vpop.permute.xlu0 %757 }
 0x148   :  { %v584_v6 = vmul.f32 %v1728_v47, %v496_v48  ;;  %933 = vperm.xlu2 %1213, %v843_v14   ;;  %v536_v44 = vpop.permute.xlu2 %535  ;;  %v428_v14 = vadd.f32 %v396_v24, %v234_v63  ;;  %v836_v24 = vld [vmem:[%s2221_s2 + $0x38] sm:$0xff] }
 0x149   :  { %v594_v52 = vmul.f32 %v1728_v47, %v536_v44  ;;  %v842_v44 = vld [vmem:[%s2221_s2 + $0x68] sm:$0xff] }
 0x14a   :  { %v1860_v33 = vadd.f32 %v584_v6, %v422_v59  ;;  %v853_v6 = vld [vmem:[%s2221_s2 + $0xc0] sm:$0xff] }
 0x14b   :  { %v1863_v62 = vadd.f32 %v594_v52, %v1675_v21 }
 0x14e   :  { %749 = vperm.xlu1 %1212, %v1472_v30   ;;  %923 = vperm.xlu0 %1219, %v841_v32   ;;  %v856_v30 = vld [vmem:[%s2221_s2 + $0xd8] sm:$0xff] }
 0x14f   :  { %v508_v49 = vpop.permute.xlu1 %507  ;;  %v1873_v0 = vpop.permute.xlu0 %745 }
 0x150   :  { %v587_v21 = vmul.f32 %v1728_v47, %v508_v49  ;;  %1214 = vset.pattern.permute.xlu2 %v2266_v20  ;;  %v548_v11 = vpop.permute.xlu2 %547 }
 0x151   :  { %v597_v38 = vmul.f32 %v1728_v47, %v548_v11  ;;  %753 = vperm.xlu2 %1214, %v1467_v29   ;;  %v571_v11 = vmul.f32 %v1728_v47, %v1710_v57 }
 0x152   :  { %v1879_v31 = vadd.f32 %v587_v21, %v425_v16 }
 0x153   :  { %v1882_v5 = vadd.f32 %v597_v38, %v1687_v17 }
 0x156   :  { %1215 = vset.pattern.permute.xlu1 %v2275_v19  ;;  %998 = vperm.xlu0 %1219, %v856_v30  }
 0x157   :  { %1013 = vperm.xlu1 %1215, %v859_v46   ;;  %v520_v17 = vpop.permute.xlu1 %519  ;;  %v1895_v29 = vpop.permute.xlu0 %733  ;;  %v857_v46 = vld [vmem:[%s2221_s2 + $0xe0] sm:$0xff] }
 0x158   :  { %v590_v40 = vmul.f32 %v1728_v47, %v520_v17  ;;  %v560_v41 = vpop.permute.xlu2 %559 }
 0x159   :  { %v600_v9 = vmul.f32 %v1728_v47, %v560_v41  ;;  %1216 = vset.pattern.permute.xlu2 %v2275_v19  ;;  %v858_v41 = vld [vmem:[%s2221_s2 + $0xe8] sm:$0xff] }
 0x15a   :  { %v1903_v48 = vadd.f32 %v590_v40, %v428_v14  ;;  %1018 = vperm.xlu2 %1216, %v860_v25   ;;  %v2279_v25 = vld [vmem:[#allocation11_spill] sm:$0xff] }
 0x15b   :  { %v1906_v59 = vadd.f32 %v600_v9, %v1699_v23  ;;  %v1920_v23 = vld [vmem:[%s2219_s0 + $0x3] ss:$0 sm:$0xff] }
 0x15e   :  { %983 = vperm.xlu0 %1219, %v853_v6  }
 0x15f   :  { %928 = vperm.xlu1 %1215, %v842_v44   ;;  %v532_v52 = vpop.permute.xlu1 %531  ;;  %v2280_v44 = vld [vmem:[#allocation27_spill] sm:$0xff] }
 0x160   :  { %v593_v32 = vmul.f32 %v1728_v47, %v532_v52  ;;  %v57_v61 = vpop.permute.xlu0 %56  ;;  %v572_v52 = vmul.f32 %v1728_v47, %v2280_v44 }
 0x161   :  { %v215_v49 = vmul.f32 %v1647_v43, %v57_v61  ;;  %v638_v16 = vpop.permute.xlu2 %637  ;;  %v852_v61 = vld [vmem:[%s2221_s2 + $0xb8] sm:$0xff] }
 0x162   :  { %v1924_v21 = vadd.f32 %v593_v32, %v1712_v51  ;;  %1217 = vset.pattern.permute.xlu2 %v2266_v20  ;;  %v765_v30 = vmul.f32 %v1920_v23, %v638_v16 }
 0x163   :  { %v409_v38 = vadd.f32 %v377_v56, %v215_v49  ;;  %741 = vperm.xlu2 %1217, %v1449_v26   ;;  %v378_v26 = vmul.f32 %v1652_v58, %v2279_v25  ;;  %v766_v56 = vmul.f32 %v1920_v23, %v1747_v60 }
 0x165   :  { %v603_v51 = vadd.f32 %v571_v11, %v409_v38 }
 0x166   :  { %898 = vperm.xlu0 %1219, %v836_v24   ;;  %v2281_v24 = vld [vmem:[#allocation12_spill] sm:$0xff] }
 0x167   :  { %1003 = vperm.xlu1 %1215, %v857_v46   ;;  %v544_v42 = vpop.permute.xlu1 %543  ;;  %v1937_v63 = vadd.f32 %v765_v30, %v603_v51  ;;  %v383_v46 = vmul.f32 %v1652_v58, %v2281_v24  ;;  %v832_v24 = vld [vmem:[%s2221_s2 + $0x18] sm:$0xff] }
 0x168   :  { %v596_v57 = vmul.f32 %v1728_v47, %v544_v42  ;;  %v62_v17 = vpop.permute.xlu0 %61 }
 0x169   :  { %v216_v14 = vmul.f32 %v1647_v43, %v62_v17  ;;  %v650_v40 = vpop.permute.xlu2 %649  ;;  %v2282_v17 = vld [vmem:[#allocation28_spill] sm:$0xff] }
 0x16a   :  { %v1947_v9 = vadd.f32 %v596_v57, %v1732_v7  ;;  %v768_v6 = vmul.f32 %v1920_v23, %v650_v40  ;;  %v577_v25 = vmul.f32 %v1728_v47, %v2282_v17 }
 0x16b   :  { %v410_v32 = vadd.f32 %v378_v26, %v216_v14  ;;  %1218 = vset.pattern.permute.xlu2 %v2275_v19  ;;  %v849_v14 = vld [vmem:[%s2221_s2 + $0xa0] sm:$0xff] }
 0x16c   :  { %1008 = vperm.xlu2 %1218, %v858_v41   ;;  %v1960_v7 = vadd.f32 %v768_v6, %v1735_v10  ;;  %v840_v10 = vld [vmem:[%s2221_s2 + $0x58] sm:$0xff]  ;;  %v771_v41 = vmul.f32 %v1920_v23, %v1764_v13  ;;  %v855_v13 = vld [vmem:[%s2221_s2 + $0xd0] sm:$0xff] }
 0x16d   :  { %v604_v49 = vadd.f32 %v572_v52, %v410_v32 }
 0x16e   :  { %978 = vperm.xlu0 %1219, %v852_v61   ;;  %v2283_v61 = vld [vmem:[#allocation14_spill] sm:$0xff] }
 0x16f   :  { %913 = vperm.xlu1 %1215, %v839_v28   ;;  %v556_v16 = vpop.permute.xlu1 %555  ;;  %v1964_v11 = vadd.f32 %v766_v56, %v604_v49  ;;  %v386_v28 = vmul.f32 %v1652_v58, %v2283_v61  ;;  %v829_v61 = vld [vmem:[%s2221_s2] sm:$0xff] }
 0x170   :  { %v599_v38 = vmul.f32 %v1728_v47, %v556_v16  ;;  %v87_v30 = vpop.permute.xlu0 %86 }
 0x171   :  { %v221_v51 = vmul.f32 %v1647_v43, %v87_v30  ;;  %v658_v42 = vpop.permute.xlu2 %657 }
 0x172   :  { %v1974_v60 = vadd.f32 %v599_v38, %v1749_v34  ;;  %v770_v57 = vmul.f32 %v1920_v23, %v658_v42  ;;  %v2284_v38 = vld [vmem:[#allocation29_spill] sm:$0xff] }
 0x173   :  { %v415_v26 = vadd.f32 %v383_v46, %v221_v51  ;;  %v580_v30 = vmul.f32 %v1728_v47, %v2284_v38  ;;  %v774_v51 = vmul.f32 %v1920_v23, %v1782_v2 }
 0x174   :  { %918 = vperm.xlu2 %1218, %v840_v10   ;;  %v1983_v40 = vadd.f32 %v770_v57, %v1752_v1 }
 0x175   :  { %v609_v6 = vadd.f32 %v577_v25, %v415_v26  ;;  %v2285_v25 = vld [vmem:[#allocation16_spill] sm:$0xff] }
 0x176   :  { %963 = vperm.xlu0 %1219, %v849_v14   ;;  %v389_v26 = vmul.f32 %v1652_v58, %v2285_v25 }
 0x177   :  { %1220 = vset.pattern.permute.xlu1 %v2266_v20  ;;  %v568_v34 = vpop.permute.xlu1 %567  ;;  %v1988_v44 = vadd.f32 %v771_v41, %v609_v6  ;;  %v838_v41 = vld [vmem:[%s2221_s2 + $0x48] sm:$0xff] }
 0x178   :  { %v602_v52 = vmul.f32 %v1728_v47, %v568_v34  ;;  %737 = vperm.xlu1 %1220, %v1454_v27   ;;  %v102_v32 = vpop.permute.xlu0 %101  ;;  %v2286_v34 = vld [vmem:[#allocation30_spill] sm:$0xff] }
 0x179   :  { %v224_v1 = vmul.f32 %v1647_v43, %v102_v32  ;;  %v670_v56 = vpop.permute.xlu2 %669 }
 0x17a   :  { %v1999_v49 = vadd.f32 %v602_v52, %v1766_v55  ;;  %v773_v16 = vmul.f32 %v1920_v23, %v670_v56  ;;  %v837_v55 = vld [vmem:[%s2221_s2 + $0x40] sm:$0xff]  ;;  %v583_v52 = vmul.f32 %v1728_v47, %v2286_v34  ;;  %v777_v56 = vmul.f32 %v1920_v23, %v1801_v36  ;;  %v2289_v36 = vld [vmem:[#allocation31_spill] sm:$0xff]  ;;  %v854_v34 = vld [vmem:[%s2221_s2 + $0xc8] sm:$0xff] }
 0x17b   :  { %v418_v27 = vadd.f32 %v386_v28, %v224_v1 }
 0x17c   :  { %993 = vperm.xlu2 %1218, %v855_v13   ;;  %v2008_v46 = vadd.f32 %v773_v16, %v1769_v53 }
 0x17d   :  { %v612_v42 = vadd.f32 %v580_v30, %v418_v27  ;;  %v2287_v27 = vld [vmem:[#allocation18_spill] sm:$0xff] }
 0x17e   :  { %878 = vperm.xlu0 %1219, %v832_v24   ;;  %v392_v24 = vmul.f32 %v1652_v58, %v2287_v27  ;;  %v835_v27 = vld [vmem:[%s2221_s2 + $0x30] sm:$0xff] }
 0x17f   :  { %v2015_v10 = vadd.f32 %v774_v51, %v612_v42 }
 0x180   :  { %1221 = vset.pattern.permute.xlu1 %v2275_v19  ;;  %v646_v57 = vpop.permute.xlu1 %645  ;;  %v117_v17 = vpop.permute.xlu0 %116 }
 0x181   :  { %v767_v53 = vmul.f32 %v1920_v23, %v646_v57  ;;  %v227_v14 = vmul.f32 %v1647_v43, %v117_v17  ;;  %v682_v2 = vpop.permute.xlu2 %681  ;;  %903 = vperm.xlu1 %1221, %v837_v55   ;;  %v586_v55 = vmul.f32 %v1728_v47, %v2289_v36  ;;  %v846_v17 = vld [vmem:[%s2221_s2 + $0x88] sm:$0xff] }
 0x182   :  { %v776_v6 = vmul.f32 %v1920_v23, %v682_v2 }
 0x183   :  { %v421_v32 = vadd.f32 %v389_v26, %v227_v14  ;;  %v2032_v28 = vadd.f32 %v767_v53, %v1786_v39  ;;  %v780_v26 = vmul.f32 %v1920_v23, %v1820_v8  ;;  %v2290_v53 = vld [vmem:[#allocation8_spill] sm:$0xff] }
 0x184   :  { %908 = vperm.xlu2 %1218, %v838_v41   ;;  %v2035_v1 = vadd.f32 %v776_v6, %v1788_v12  ;;  %v2288_v12 = vld [vmem:[#allocation9_spill] sm:$0xff] }
 0x185   :  { %v615_v13 = vadd.f32 %v583_v52, %v421_v32  ;;  %v2291_v52 = vld [vmem:[#allocation20_spill] sm:$0xff] }
 0x186   :  { %863 = vperm.xlu0 %1219, %v829_v61  }
 0x187   :  { %v2039_v16 = vadd.f32 %v777_v56, %v615_v13  ;;  %v2292_v13 = vld [vmem:[#allocation32_spill] sm:$0xff] }
 0x188   :  { %v654_v38 = vpop.permute.xlu1 %653  ;;  %v132_v30 = vpop.permute.xlu0 %131 }
 0x189   :  { %v769_v51 = vmul.f32 %v1920_v23, %v654_v38  ;;  %v230_v39 = vmul.f32 %v1647_v43, %v132_v30  ;;  %v2045_v42 = vpop.permute.xlu2 %693  ;;  %1222 = vset.pattern.permute.xlu1 %v2266_v20  ;;  %v589_v38 = vmul.f32 %v1728_v47, %v2292_v13 }
 0x18a   :  { %725 = vperm.xlu1 %1222, %v2288_v12  }
 0x18b   :  { %v424_v57 = vadd.f32 %v392_v24, %v230_v39  ;;  %v2055_v25 = vadd.f32 %v769_v51, %v1805_v35  ;;  %v395_v35 = vmul.f32 %v1652_v58, %v2291_v52  ;;  %v783_v39 = vmul.f32 %v1920_v23, %v1835_v4 }
 0x18c   :  { %1223 = vset.pattern.permute.xlu2 %v2266_v20 }
 0x18d   :  { %729 = vperm.xlu2 %1223, %v2290_v53   ;;  %v618_v14 = vadd.f32 %v586_v55, %v424_v57 }
 0x18e   :  { %948 = vperm.xlu0 %1219, %v846_v17   ;;  %v2293_v17 = vld [vmem:[#allocation22_spill] sm:$0xff] }
 0x18f   :  { %v2061_v2 = vadd.f32 %v780_v26, %v618_v14  ;;  %v398_v26 = vmul.f32 %v1652_v58, %v2293_v17 }
 0x190   :  { %v666_v41 = vpop.permute.xlu1 %665  ;;  %v147_v6 = vpop.permute.xlu0 %146 }
 0x191   :  { %v772_v32 = vmul.f32 %v1920_v23, %v666_v41  ;;  %v233_v61 = vmul.f32 %v1647_v43, %v147_v6  ;;  %v706_v8 = vpop.permute.xlu2 %705  ;;  %v2294_v41 = vld [vmem:[#allocation33_spill] sm:$0xff] }
 0x192   :  { %v782_v56 = vmul.f32 %v1920_v23, %v706_v8  ;;  %1224 = vset.pattern.permute.xlu1 %v2275_v19  ;;  %v592_v4 = vmul.f32 %v1728_v47, %v2294_v41  ;;  %v831_v41 = vld [vmem:[%s2221_s2 + $0x10] sm:$0xff] }
 0x193   :  { %v427_v30 = vadd.f32 %v395_v35, %v233_v61  ;;  %988 = vperm.xlu1 %1224, %v854_v34   ;;  %v2078_v24 = vadd.f32 %v772_v32, %v1824_v45  ;;  %v851_v34 = vld [vmem:[%s2221_s2 + $0xb0] sm:$0xff] }
 0x194   :  { %v2081_v51 = vadd.f32 %v782_v56, %v1826_v18  ;;  %v2295_v56 = vld [vmem:[#allocation23_spill] sm:$0xff] }
 0x195   :  { %1225 = vset.pattern.permute.xlu2 %v2275_v19  ;;  %v621_v12 = vadd.f32 %v589_v38, %v427_v30 }
 0x196   :  { %893 = vperm.xlu2 %1225, %v835_v27   ;;  %v834_v27 = vld [vmem:[%s2221_s2 + $0x28] sm:$0xff] }
 0x197   :  { %v2086_v36 = vadd.f32 %v783_v39, %v621_v12  ;;  %v789_v39 = vmul.f32 %v1920_v23, %v1895_v29  ;;  %v598_v29 = vmul.f32 %v1728_v47, %v1703_v50 }
 0x198   :  { %v678_v55 = vpop.permute.xlu1 %677  ;;  %v162_v57 = vpop.permute.xlu0 %161 }
 0x199   :  { %v775_v45 = vmul.f32 %v1920_v23, %v678_v55  ;;  %v236_v53 = vmul.f32 %v1647_v43, %v162_v57  ;;  %v718_v18 = vpop.permute.xlu2 %717 }
 0x19a   :  { %v785_v14 = vmul.f32 %v1920_v23, %v718_v18 }
 0x19b   :  { %v430_v6 = vadd.f32 %v398_v26, %v236_v53  ;;  %1226 = vset.pattern.permute.xlu1 %v2266_v20  ;;  %v2100_v52 = vadd.f32 %v775_v45, %v1839_v3  ;;  %v401_v20 = vmul.f32 %v1652_v58, %v2295_v56  ;;  %v833_v3 = vld [vmem:[%s2221_s2 + $0x20] sm:$0xff]  ;;  %v2297_v26 = vld [vmem:[#allocation25_spill] sm:$0xff] }
 0x19c   :  { %721 = vperm.xlu1 %1226, %v1423_v22   ;;  %v2104_v35 = vadd.f32 %v785_v14, %v1842_v54  ;;  %v2296_v22 = vld [vmem:[#allocation34_spill] sm:$0xff]  ;;  %v404_v45 = vmul.f32 %v1652_v58, %v2297_v26 }
 0x19d   :  { %v2106_v32 = vadd.f32 %v592_v4, %v430_v6  ;;  %v595_v54 = vmul.f32 %v1728_v47, %v2296_v22  ;;  %v779_v22 = vmul.f32 %v1920_v23, %v2045_v42 }
 0x19e   :  { %973 = vperm.xlu2 %1225, %v851_v34   ;;  %v792_v34 = vmul.f32 %v1920_v23, %v1873_v0  ;;  %v847_v0 = vld [vmem:[%s2221_s2 + $0x90] sm:$0xff] }
 0x1a0   :  { %v2108_v61 = vpop.permute.xlu1 %689  ;;  %v177_v8 = vpop.permute.xlu0 %176 }
 0x1a1   :  { %v239_v13 = vmul.f32 %v1647_v43, %v177_v8 }
 0x1a2   :  { %v934_v38 = vpop.permute.xlu2 %933 }
 0x1a3   :  { %v433_v30 = vadd.f32 %v401_v20, %v239_v13 }
 0x1a4   :  { %1227 = vset.pattern.permute.xlu1 %v2275_v19  ;;  %v850_v19 = vld [vmem:[%s2221_s2 + $0xa8] sm:$0xff] }
 0x1a5   :  { %883 = vperm.xlu1 %1227, %v833_v3   ;;  %v627_v12 = vadd.f32 %v595_v54, %v433_v30  ;;  %v2298_v3 = vld [vmem:[#allocation26_spill] sm:$0xff]  ;;  %v2299_v30 = vld [vmem:[#allocation35_spill] sm:$0xff] }
 0x1a6   :  { %888 = vperm.xlu2 %1225, %v834_v27   ;;  %v407_v50 = vmul.f32 %v1652_v58, %v2298_v3  ;;  %v601_v27 = vmul.f32 %v1728_v47, %v2299_v30 }
 0x1a7   :  { %v2124_v55 = vadd.f32 %v789_v39, %v627_v12  ;;  %v848_v12 = vld [vmem:[%s2221_s2 + $0x98] sm:$0xff] }
 0x1a8   :  { %v702_v57 = vpop.permute.xlu1 %701  ;;  %v192_v17 = vpop.permute.xlu0 %191 }
 0x1a9   :  { %v781_v53 = vmul.f32 %v1920_v23, %v702_v57  ;;  %v242_v18 = vmul.f32 %v1647_v43, %v192_v17  ;;  %v795_v57 = vmul.f32 %v1920_v23, %v1856_v37  ;;  %v845_v37 = vld [vmem:[%s2221_s2 + $0x80] sm:$0xff] }
 0x1ab   :  { %v436_v14 = vadd.f32 %v404_v45, %v242_v18  ;;  %v2139_v4 = vadd.f32 %v781_v53, %v1879_v31  ;;  %v754_v6 = vpop.permute.xlu2 %753 }
 0x1ad   :  { %968 = vperm.xlu1 %1227, %v850_v19   ;;  %v630_v8 = vadd.f32 %v598_v29, %v436_v14 }
 0x1ae   :  { %873 = vperm.xlu2 %1225, %v831_v41  }
 0x1af   :  { %v824_v56 = vadd.f32 %v792_v34, %v630_v8 }
 0x1b0   :  { %v714_v20 = vpop.permute.xlu1 %713  ;;  %v207_v13 = vpop.permute.xlu0 %206 }
 0x1b1   :  { %v784_v54 = vmul.f32 %v1920_v23, %v714_v20  ;;  %v245_v31 = vmul.f32 %v1647_v43, %v207_v13  ;;  %v811_v43 = vadd.f32 %v779_v22, %v1807_v15  ;;  %v778_v22 = vmul.f32 %v1920_v23, %v2108_v61 }
 0x1b3   :  { %v439_v39 = vadd.f32 %v407_v50, %v245_v31  ;;  %v2158_v58 = vadd.f32 %v784_v54, %v1903_v48  ;;  %v1035_v26 = vadd.f32 %v934_v38, %v811_v43  ;;  %v830_v48 = vld [vmem:[%s2221_s2 + $0x8] sm:$0xff] }
 0x1b4   :  { %v1019_v42 = vpop.permute.xlu2 %1018 }
 0x1b5   :  { %953 = vperm.xlu1 %1227, %v847_v0   ;;  %v633_v17 = vadd.f32 %v601_v27, %v439_v39  ;;  %v1067_v19 = vmax.f32 %v1035_v26, 0.0 }
 0x1b6   :  { %958 = vperm.xlu2 %1225, %v848_v12   ;;  %v810_v12 = vadd.f32 %v778_v22, %v1860_v33 }
 0x1b7   :  { %v827_v45 = vadd.f32 %v795_v57, %v633_v17 }
 0x1b8   :  { %v762_v47 = vpop.permute.xlu1 %761  ;;  %v939_v53 = vpop.permute.xlu0 %938 }
 0x1b9   :  { %v1036_v18 = vadd.f32 %v939_v53, %v2061_v2  ;;  %v796_v38 = vmul.f32 %v1920_v23, %v762_v47  ;;  %v1102_v2 = vld [vmem:[%s2223_s4] sm:$0x1f] }
 0x1bb   :  { %v1068_v29 = vmax.f32 %v1036_v18, 0.0  ;;  %v828_v34 = vadd.f32 %v796_v38, %v1999_v49 }
 0x1bd   :  { %v742_v15 = vpop.permute.xlu2 %741  ;;  %868 = vperm.xlu1 %1227, %v830_v48   ;;  %v1093_v14 = vpack.c.bf16 %v1068_v29, %v1067_v19  ;;  %v1052_v13 = vadd.f32 %v1019_v42, %v828_v34  ;;  %v794_v42 = vmul.f32 %v1920_v23, %v754_v6 }
 0x1be   :  { %943 = vperm.xlu2 %1225, %v845_v37   ;;  %v791_v49 = vmul.f32 %v1920_v23, %v742_v15 }
 0x1bf   :  { %1115 = vmatpush.bf16.msra.mxu0 %v1093_v14  ;;  %v1084_v31 = vmax.f32 %v1052_v13, 0.0  ;;  %v826_v53 = vadd.f32 %v794_v42, %v1906_v59 }
 0x1c0   :  { %v750_v41 = vpop.permute.xlu1 %749  ;;  %v924_v8 = vpop.permute.xlu0 %923  ;;  %v823_v47 = vadd.f32 %v791_v49, %v1882_v5 }
 0x1c1   :  { %v1033_v39 = vadd.f32 %v924_v8, %v2039_v16  ;;  %v793_v17 = vmul.f32 %v1920_v23, %v750_v41 }
 0x1c3   :  { %v1065_v26 = vmax.f32 %v1033_v39, 0.0  ;;  %v825_v29 = vadd.f32 %v793_v17, %v1974_v60 }
 0x1c5   :  { %1105 = vperm.xlu1 %1227, %v1102_v2  }
 0x1c6   :  { %v1009_v20 = vpop.permute.xlu2 %1008 }
 0x1c7   :  { %v1050_v19 = vadd.f32 %v1009_v20, %v826_v53 }
 0x1c8   :  { %v999_v0 = vpop.permute.xlu0 %998 }
 0x1c9   :  { %v1014_v3 = vpop.permute.xlu1 %1013  ;;  %v1082_v41 = vmax.f32 %v1050_v19, 0.0 }
 0x1ca   :  { %v1051_v50 = vadd.f32 %v1014_v3, %v827_v45  ;;  %v1048_v45 = vadd.f32 %v999_v0, %v824_v56 }
 0x1cc   :  { %v1083_v54 = vmax.f32 %v1051_v50, 0.0  ;;  %v1080_v37 = vmax.f32 %v1048_v45, 0.0 }
 0x1ce   :  { %v919_v30 = vpop.permute.xlu2 %918  ;;  %v1101_v27 = vpack.c.bf16 %v1084_v31, %v1083_v54 }
 0x1cf   :  { %v1032_v5 = vadd.f32 %v919_v30, %v2035_v1 }
 0x1d0   :  { %1128 = vmatpush.bf16.msra.mxu1 %v1101_v27  ;;  %v984_v33 = vpop.permute.xlu0 %983 }
 0x1d1   :  { %v929_v57 = vpop.permute.xlu1 %928  ;;  %v1064_v13 = vmax.f32 %v1032_v5, 0.0 }
 0x1d2   :  { %v1034_v43 = vadd.f32 %v929_v57, %v810_v12 }
 0x1d4   :  { %v1066_v61 = vmax.f32 %v1034_v43, 0.0 }
 0x1d6   :  { %v994_v18 = vpop.permute.xlu2 %993  ;;  %v1092_v16 = vpack.c.bf16 %v1066_v61, %v1065_v26 }
 0x1d7   :  { %v1047_v48 = vadd.f32 %v994_v18, %v823_v47 }
 0x1d8   :  { %1116 = vmatpush.bf16.msra.mxu0 %v1092_v16  ;;  %v899_v8 = vpop.permute.xlu0 %898 }
 0x1d9   :  { %v1079_v6 = vmax.f32 %v1047_v48, 0.0  ;;  %v1004_v15 = vpop.permute.xlu1 %1003  ;;  %v1028_v31 = vadd.f32 %v899_v8, %v2078_v24 }
 0x1da   :  { %v1049_v14 = vadd.f32 %v1004_v15, %v825_v29  ;;  %v1045_v29 = vadd.f32 %v984_v33, %v2124_v55 }
 0x1db   :  { %v1099_v38 = vpack.c.bf16 %v1080_v37, %v1079_v6  ;;  %v1060_v30 = vmax.f32 %v1028_v31, 0.0 }
 0x1dc   :  { %v1081_v2 = vmax.f32 %v1049_v14, 0.0 }
 0x1de   :  { %v909_v56 = vpop.permute.xlu2 %908  ;;  %v1100_v34 = vpack.c.bf16 %v1082_v41, %v1081_v2 }
 0x1df   :  { %v1030_v1 = vadd.f32 %v909_v56, %v2015_v10 }
 0x1e0   :  { %1129 = vmatpush.bf16.msra.mxu1 %v1100_v34  ;;  %v979_v54 = vpop.permute.xlu0 %978 }
 0x1e1   :  { %v914_v59 = vpop.permute.xlu1 %913  ;;  %v1062_v57 = vmax.f32 %v1030_v1, 0.0 }
 0x1e2   :  { %v1031_v20 = vadd.f32 %v914_v59, %v2100_v52 }
 0x1e4   :  { %v1063_v3 = vmax.f32 %v1031_v20, 0.0  ;;  %1130 = vmatpush.bf16.msra.mxu1 %v1099_v38  ;;  %v1077_v38 = vmax.f32 %v1045_v29, 0.0 }
 0x1e6   :  { %v1091_v60 = vpack.c.bf16 %v1064_v13, %v1063_v3 }
 0x1e7   :  { %v730_v50 = vpop.permute.xlu2 %729 }
 0x1e8   :  { %1117 = vmatpush.bf16.msra.mxu0 %v1091_v60  ;;  %v964_v42 = vpop.permute.xlu0 %963  ;;  %v788_v17 = vmul.f32 %v1920_v23, %v730_v50 }
 0x1ea   :  { %v738_v22 = vpop.permute.xlu1 %737  ;;  %v820_v24 = vadd.f32 %v788_v17, %v1863_v62 }
 0x1ec   :  { %v1044_v47 = vadd.f32 %v979_v54, %v820_v24 }
 0x1ee   :  { %v1076_v19 = vmax.f32 %v1044_v47, 0.0  ;;  %v1141_v47 = vlaneseq }
 0x1f0   :  { %v894_v0 = vpop.permute.xlu2 %893  ;;  %v879_v53 = vpop.permute.xlu0 %878 }
 0x1f1   :  { %v1027_v27 = vadd.f32 %v894_v0, %v1988_v44  ;;  %v1024_v14 = vadd.f32 %v879_v53, %v1960_v7  ;;  %v1142_v53 = vshrl.u32 %v1141_v47, 7 }
 0x1f3   :  { %v1059_v39 = vmax.f32 %v1027_v27, 0.0  ;;  %v904_v12 = vpop.permute.xlu1 %903  ;;  %v1056_v5 = vmax.f32 %v1024_v14, 0.0  ;;  %vm1143_vm0 = vcmp.eq.s32.totalorder %v1142_v53, 4 }
 0x1f4   :  { %v1029_v52 = vadd.f32 %v904_v12, %v2008_v46  ;;  %v790_v46 = vmul.f32 %v1920_v23, %v738_v22 }
 0x1f5   :  { %v1089_v49 = vpack.c.bf16 %v1060_v30, %v1059_v39  ;;  %v1041_v30 = vadd.f32 %v964_v42, %v2104_v35  ;;  %v1085_v35 = vld [vmem:[%s2222_s3] sm:$0x77]  ;;  %s1268_s3 = smov [#allocation2]  }
 0x1f6   :  { %v1061_v43 = vmax.f32 %v1029_v52, 0.0  ;;  %v822_v37 = vadd.f32 %v790_v46, %v1947_v9  ;;  %s1186_s26 = sshll.u32 %s1268_s3, 4  ;;  %s1187_s26 = int_to_ptr.vmem [resolvable:$true] %s1186_s26 }
 0x1f7   :  { %v1073_v12 = vmax.f32 %v1041_v30, 0.0 }
 0x1f8   :  { %v974_v26 = vpop.permute.xlu2 %973  ;;  %v1090_v61 = vpack.c.bf16 %v1062_v57, %v1061_v43  ;;  %v864_v56 = vpop.permute.xlu0 %863 }
 0x1f9   :  { %v1021_v17 = vadd.f32 %v864_v56, %v1937_v63 }
 0x1fa   :  { %1118 = vmatpush.bf16.msra.mxu0 %v1090_v61 }
 0x1fc   :  { %v726_v45 = vpop.permute.xlu1 %725 }
 0x1fd   :  { %v787_v44 = vmul.f32 %v1920_v23, %v726_v45  ;;  %v1053_v45 = vmax.f32 %v1021_v17, 0.0 }
 0x1fe   :  { %1119 = vmatpush.bf16.msra.mxu0 %v1089_v49 }
 0x1ff   :  { %v819_v10 = vadd.f32 %v787_v44, %v1924_v21 }
 0x200   :  { %v889_v18 = vpop.permute.xlu2 %888  ;;  %v949_v9 = vpop.permute.xlu0 %948 }
 0x201   :  { %v1043_v16 = vadd.f32 %v974_v26, %v819_v10  ;;  %v1026_v33 = vadd.f32 %v889_v18, %v1983_v40  ;;  %v1038_v13 = vadd.f32 %v949_v9, %v2081_v51 }
 0x203   :  { %v1075_v48 = vmax.f32 %v1043_v16, 0.0  ;;  %v1058_v50 = vmax.f32 %v1026_v33, 0.0  ;;  %v1070_v31 = vmax.f32 %v1038_v13, 0.0 }
 0x205   :  { %v989_v6 = vpop.permute.xlu1 %988  ;;  %v1097_v62 = vpack.c.bf16 %v1076_v19, %v1075_v48 }
 0x206   :  { %v1046_v15 = vadd.f32 %v989_v6, %v822_v37 }
 0x208   :  { %v1078_v41 = vmax.f32 %v1046_v15, 0.0  ;;  %v874_v21 = vpop.permute.xlu2 %873 }
 0x209   :  { %v1023_v2 = vadd.f32 %v874_v21, %v2032_v28 }
 0x20a   :  { %v1098_v34 = vpack.c.bf16 %v1078_v41, %v1077_v38 }
 0x20b   :  { %v1055_v59 = vmax.f32 %v1023_v2, 0.0 }
 0x20c   :  { %1131 = vmatpush.bf16.msra.mxu1 %v1098_v34 }
 0x20d   :  { %v1087_v8 = vpack.c.bf16 %v1056_v5, %v1055_v59 }
 0x20e   :  { %v722_v20 = vpop.permute.xlu1 %721 }
 0x20f   :  { %v786_v22 = vmul.f32 %v1920_v23, %v722_v20 }
 0x210   :  { %v959_v55 = vpop.permute.xlu2 %958  ;;  %1132 = vmatpush.bf16.msra.mxu1 %v1097_v62 }
 0x211   :  { %v818_v40 = vadd.f32 %v786_v22, %v2106_v32  ;;  %v1110_v32 = vunpack.c.h.b16 %v1085_v35 }
 0x213   :  { %v1112_v24 = vpack.c.b16 %v1110_v32, %v1110_v32 }
 0x217   :  { %v884_v7 = vpop.permute.xlu1 %883 }
 0x218   :  { %v1025_v3 = vadd.f32 %v884_v7, %v2055_v25  ;;  %v944_v60 = vpop.permute.xlu2 %943 }
 0x219   :  { %v1037_v28 = vadd.f32 %v944_v60, %v2139_v4  ;;  %v1040_v4 = vadd.f32 %v959_v55, %v2158_v58  ;;  %v1109_v58 = vunpack.c.l.b16 %v1085_v35 }
 0x21a   :  { %v1057_v54 = vmax.f32 %v1025_v3, 0.0 }
 0x21b   :  { %v1069_v0 = vmax.f32 %v1037_v28, 0.0  ;;  %v1072_v57 = vmax.f32 %v1040_v4, 0.0  ;;  %v1111_v10 = vpack.c.b16 %v1109_v58, %v1109_v58 }
 0x21c   :  { %v1088_v27 = vpack.c.bf16 %v1058_v50, %v1057_v54 }
 0x21d   :  { %v1094_v1 = vpack.c.bf16 %v1070_v31, %v1069_v0 }
 0x21e   :  { %1120 = vmatpush.bf16.msra.mxu0 %v1088_v27 }
 0x21f   :  { %v969_v51 = vpop.permute.xlu1 %968 }
 0x220   :  { %v1042_v39 = vadd.f32 %v969_v51, %v818_v40 }
 0x222   :  { %v1074_v25 = vmax.f32 %v1042_v39, 0.0  ;;  %1121 = vmatpush.bf16.msra.mxu0 %v1087_v8 }
 0x224   :  { %v1096_v52 = vpack.c.bf16 %v1074_v25, %v1073_v12 }
 0x226   :  { %1133 = vmatpush.bf16.msra.mxu1 %v1096_v52 }
 0x227   :  { %v954_v23 = vpop.permute.xlu1 %953 }
 0x228   :  { %v1039_v49 = vadd.f32 %v954_v23, %v2086_v36 }
 0x22a   :  { %v1071_v43 = vmax.f32 %v1039_v49, 0.0 }
 0x22c   :  { %v1095_v42 = vpack.c.bf16 %v1072_v57, %v1071_v43 }
 0x22e   :  { %1134 = vmatpush.bf16.msra.mxu1 %v1095_v42 }
 0x22f   :  { %v869_v26 = vpop.permute.xlu1 %868 }
 0x230   :  { %v1022_v61 = vadd.f32 %v869_v26, %v1964_v11 }
 0x232   :  { %v1054_v44 = vmax.f32 %v1022_v61, 0.0  ;;  %1135 = vmatpush.bf16.msra.mxu1 %v1094_v1 }
 0x234   :  { %v1086_v36 = vpack.c.bf16 %v1054_v44, %v1053_v45 }
 0x235   :  { %1136 = vmatmul.bf16.vlgmr.msra.gmra.mxu1 %v1112_v24 }
 0x236   :  { %1122 = vmatpush.bf16.msra.mxu0 %v1086_v36 }
 0x237   :  { %v1106_v18 = vpop.permute.xlu1 %1105 }
 0x239   :  { %1123 = vmatmul.bf16.vlgmr.msra.gmra.mxu0 %v1111_v10 }
 0x2b2   :  { %v1137_v46 = vpop.f32.mrf.mxu1 }
 0x2b6   :  { %v1124_v16 = vpop.f32.mrf.mxu0 }
 0x2b7   :  { %v1125_v63 = vadd.f32 %v1124_v16, %v1106_v18 }
 0x2b9   :  { %v1138_v48 = vadd.f32 %v1137_v46, %v1125_v63 }
 0x2ba   :  { %v1139_v11 = vpop.f32.mrf.mxu1 }
 0x2bb   :  { %v1144_v19 = vsel %vm1143_vm0, -inf, %v1138_v48 }
 0x2bc   :  { %v1146_v29 = vsel %vm1145_vm1, %v1144_v19, -inf }
 0x2bd   :  { %v1147_v37 = vrot.slane %v1146_v29, 4 }
 0x2be   :  { %v1126_v6 = vpop.f32.mrf.mxu0 }
 0x2bf   :  { %v1148_v62 = vmax.f32 %v1146_v29, %v1147_v37 }
 0x2c1   :  { %v1149_v15 = vrot.slane %v1148_v62, 2 }
 0x2c3   :  { %v1150_v14 = vmax.f32 %v1148_v62, %v1149_v15 }
 0x2c5   :  { %v1151_v38 = vrot.slane %v1150_v14, 1 }
 0x2c7   :  { %v1152_v41 = vmax.f32 %v1150_v14, %v1151_v38 }
 0x2c9   :  { %v1153_v21 = vsub.f32 %v1144_v19, %v1152_v41 }
 0x2cb   :  { %v1154_v2 = vmul.f32 1.442695, %v1153_v21 }
 0x2cd   :  { %1232 = vpow2.f32 %v1154_v2 }
 0x2d3   :  { %v1233_v56 = vpop.eup %1232 }
 0x2d4   :  { %v1156_v34 = vsel %vm1145_vm1, %v1233_v56, 0.0 }
 0x2d5   :  { %v1157_v5 = vrot.slane %v1156_v34, 4 }
 0x2d7   :  { %v1158_v59 = vadd.f32 %v1157_v5, %v1156_v34 }
 0x2d9   :  { %v1159_v8 = vrot.slane %v1158_v59, 2 }
 0x2db   :  { %v1160_v20 = vadd.f32 %v1159_v8, %v1158_v59 }
 0x2dd   :  { %v1161_v55 = vrot.slane %v1160_v20, 1 }
 0x2df   :  { %v1162_v9 = vadd.f32 %v1161_v55, %v1160_v20 }
 0x2e1   :  { %1234 = vrcp.f32 %v1162_v9  ;;  %v1174_v3 = vand.u32 2147483648, %v1162_v9  ;;  %v1172_v28 = vand.u32 2147483647, %v1162_v9  ;;  %vm1168_vm3 = vweird.f32 %v1162_v9 }
 0x2e2   :  { %1236 = vtanh.f32 %v1138_v48 }
 0x2e3   :  { %v1175_v22 = vor.u32 1.1754944e-38, %v1174_v3  ;;  %vm1173_vm5 = vcmp.eq.f32.partialorder %v1172_v28, 8.507059e+37 }
 0x2e7   :  { %v1235_v33 = vpop.eup %1234 }
 0x2e8   :  { %v1164_v13 = vmul.f32 %v1235_v33, %v1162_v9  ;;  %vm1169_vm2 = vweird.f32 %v1235_v33  ;;  %v1237_v27 = vpop.eup %1236 }
 0x2e9   :  { %vm1170_vm4 = vmor %vm1168_vm3, %vm1169_vm2 }
 0x2ea   :  { %v1165_v7 = vsub.f32 1.0, %v1164_v13 }
 0x2ec   :  { %v1166_v60 = vmul.f32 %v1235_v33, %v1165_v7 }
 0x2ee   :  { %v1167_v50 = vadd.f32 %v1235_v33, %v1166_v60 }
 0x2f0   :  { %v1171_v54 = vsel %vm1170_vm4, %v1235_v33, %v1167_v50 }
 0x2f1   :  { %v1176_v31 = vsel %vm1173_vm5, %v1175_v22, %v1171_v54 }
 0x2f2   :  { %v1177_v0 = vmul.f32 %v1233_v56, %v1176_v31 }
 0x2f4   :  { %v1179_v1 = vsel %vm1143_vm0, %v1237_v27, %v1177_v0 }
 0x2f5   :  { %1180 = vst [vmem:[#allocation2] sm:$0x1f] %v1179_v1 }
 0x2f6   :  { %1191 = dma.vmem_to_hbm [thread:$0]  %s1187_s26, 128, %s1189_s29, [#allocation3]  }
 0x2f7   :  { %1262 = dma.done.wait [#allocation3], 128  }
 0x2f8   :  { %1263 = vsyncadd [#allocation3], 4294967168 }
 0x2f9   :  { %1196 = vsyncpa [#allocation3], 1 }

</bundles_post_ra>
